<compile_context>
chip_gen: v7x
topology: tpu7x:2x2x1
jax: 0.10.0
libtpu: 0.0.40
codegen_flags: <defaults>
</compile_context>

<pallas_src>
import jax
import jax.numpy as jnp
from jax.experimental import pallas as pl
from jax.experimental.pallas import tpu as pltpu


def _outconv_kernel(x_ref, w_ref, b_ref, ah_ref, awt_ref, o_ref):
    # x_ref  : VMEM (bt, C_in, H, W)              input dtype (lane = W)
    # w_ref  : SMEM (C_out, C_in)          f32    1x1 conv weights (scalar reads)
    # b_ref  : SMEM (C_out,)               f32    conv bias
    # ah_ref : VMEM (H_out, H)             f32    row-interp matrix (align_corners=True)
    # awt_ref: VMEM (W, W_out)             f32    col-interp matrix, pre-transposed
    # o_ref  : VMEM (bt, C_out, H_out, W_out)     output block (lane = W_out)
    bt, c_in = x_ref.shape[0], x_ref.shape[1]
    c_out = o_ref.shape[1]

    ah = ah_ref[...]        # (H_out, H)  f32, hoisted out of the unrolled loops
    awt = awt_ref[...]      # (W, W_out)  f32

    # Small static unroll: bt * c_out channel pipelines (bt, C_out are small by construction).
    for b in range(bt):
        for c in range(c_out):
            # --- 1x1 conv for (b, c): VPU multiply-accumulate over input channels, f32.
            y = x_ref[b, 0].astype(jnp.float32) * w_ref[c, 0]           # (H, W)
            for i in range(1, c_in):
                y = y + x_ref[b, i].astype(jnp.float32) * w_ref[c, i]
            y = y + b_ref[c]                                            # bias (scalar bcast)

            # --- width upsample (lane dim):  (H, W) @ (W, W_out)  -> (H, W_out).
            t = jnp.dot(y, awt, preferred_element_type=jnp.float32)

            # --- height upsample (sublane dim): (H_out, H) @ (H, W_out) -> (H_out, W_out).
            z = jnp.dot(ah, t, preferred_element_type=jnp.float32)

            # --- direct lane-dense store of this channel's slab (no relayout/reshape).
            o_ref[b, c] = z.astype(o_ref.dtype)


def _bilinear_matrix(n_in: int, n_out: int) -> jnp.ndarray:
    """Dense (n_out, n_in) interpolation matrix matching PyTorch bilinear, align_corners=True."""
    scale = 0.0 if (n_out == 1 or n_in == 1) else (n_in - 1) / (n_out - 1)
    src = jnp.arange(n_out, dtype=jnp.float32) * jnp.float32(scale)
    lo = jnp.clip(jnp.floor(src).astype(jnp.int32), 0, n_in - 1)
    hi = jnp.clip(lo + 1, 0, n_in - 1)
    frac = src - lo.astype(jnp.float32)
    rows = jnp.arange(n_out)
    a = jnp.zeros((n_out, n_in), jnp.float32)
    a = a.at[rows, lo].add(1.0 - frac)
    a = a.at[rows, hi].add(frac)
    return a


def out_conv(x, weight, bias, *, out_dtype=None):
    """x: (B, C_in, H, W); weight: (C_out, C_in, 1, 1); bias: (C_out,).

    Returns (B, C_out, 2H, 2W) in `out_dtype` (default: x.dtype; pass jnp.bfloat16 to halve
    output HBM traffic on v5e when f32 is not needed downstream).
    """
    b_sz, c_in, h, w = x.shape
    c_out = weight.shape[0]
    h_out, w_out = 2 * h, 2 * w
    out_dtype = x.dtype if out_dtype is None else out_dtype

    # Constants (tiny): f32 interp matrices keep align_corners fractions exact.
    w2d = weight.reshape(c_out, c_in).astype(jnp.float32)
    bias_v = bias.astype(jnp.float32).reshape(c_out)
    ah = _bilinear_matrix(h, h_out)                     # (H_out, H)   f32
    awt = _bilinear_matrix(w, w_out).T                  # (W, W_out)   f32

    # VMEM cap: generation-aware, ~15% headroom for compiler scratch.
    try:
        vmem_cap = int(pltpu.get_tpu_info().vmem_capacity_bytes)
    except Exception:                                   # conservative fallback
        vmem_cap = 64 * 1024 * 1024
    vmem_limit = int(0.85 * vmem_cap)

    # Fold small batches into one grid step (amortize ~0.35us/step overhead) while staying
    # well under the double-buffered VMEM budget and keeping the channel unroll small.
    x_bytes = c_in * h * w * x.dtype.itemsize
    o_bytes = c_out * h_out * w_out * jnp.dtype(out_dtype).itemsize
    const_bytes = (h_out * h + w * w_out + c_out * c_in + c_out) * 4
    live_f32 = (h * w + h * w_out + h_out * w_out) * 4
    budget = max(vmem_limit // 2 - const_bytes - live_f32, x_bytes + o_bytes)
    bt = 1
    for cand in range(1, b_sz + 1):
        if b_sz % cand == 0 and cand * c_out <= 16 and 2 * cand * (x_bytes + o_bytes) <= budget:
            bt = cand

    # Scheduler hint.
    flops = 2 * b_sz * c_out * (c_in * h * w + h * w * w_out + h_out * h * w_out)
    bytes_accessed = (x.size * x.dtype.itemsize
                      + b_sz * c_out * h_out * w_out * jnp.dtype(out_dtype).itemsize
                      + const_bytes)

    out = pl.pallas_call(
        _outconv_kernel,
        out_shape=jax.ShapeDtypeStruct((b_sz, c_out, h_out, w_out), out_dtype),
        grid=(b_sz // bt,),
        in_specs=[
            pl.BlockSpec((bt, c_in, h, w), lambda g: (g, 0, 0, 0)),        # x, lane = W
            pl.BlockSpec(memory_space=pltpu.MemorySpace.SMEM),             # conv weights
            pl.BlockSpec(memory_space=pltpu.MemorySpace.SMEM),             # conv bias
            pl.BlockSpec((h_out, h), lambda g: (0, 0)),                    # Ah  (constant)
            pl.BlockSpec((w, w_out), lambda g: (0, 0)),                    # Aw^T (constant)
        ],
        out_specs=pl.BlockSpec((bt, c_out, h_out, w_out), lambda g: (g, 0, 0, 0)),
        compiler_params=pltpu.CompilerParams(
            dimension_semantics=("parallel",),
            vmem_limit_bytes=vmem_limit,
        ),
        cost_estimate=pl.CostEstimate(flops=flops, transcendentals=0,
                                      bytes_accessed=bytes_accessed),
    )(x, w2d, bias_v, ah, awt)

    return out


def _reference(x, weight, bias):
    """Pure-JAX f32 reference: 1x1 conv + separable bilinear upsample (align_corners=True)."""
    c_out, c_in = weight.shape[0], weight.shape[1]
    h, w = x.shape[2], x.shape[3]
    y = jnp.einsum("oc,bchw->bohw", weight.reshape(c_out, c_in), x) + bias[None, :, None, None]
    ah = _bilinear_matrix(h, 2 * h)
    aw = _bilinear_matrix(w, 2 * w)
    z = jnp.einsum("Hh,bohw->boHw", ah, y)
    z = jnp.einsum("Ww,boHw->boHW", aw, z)
    return z


if __name__ == "__main__":
    B, C_IN, C_OUT, H, W = 2, 4, 3, 16, 16
    key = jax.random.PRNGKey(0)
    kx, kw, kb = jax.random.split(key, 3)
    x = jax.random.normal(kx, (B, C_IN, H, W), dtype=jnp.float32)
    # Deterministic synthetic parameters (Conv2d(C_IN, C_OUT, kernel_size=1) shapes).
    weight = jax.random.normal(kw, (C_OUT, C_IN, 1, 1), dtype=jnp.float32) * 0.1
    bias = jax.random.normal(kb, (C_OUT,), dtype=jnp.float32) * 0.1

    out = out_conv(x, weight, bias)
    out = jax.block_until_ready(out)
    assert out.shape == (B, C_OUT, 2 * H, 2 * W), out.shape

    ref = _reference(x, weight, bias)
    # f32 conv (VPU) + f32 interp matrices: only residual error is MXU default-precision
    # rounding in the two small upsample matmuls.
    assert jnp.allclose(out, ref, atol=2e-2, rtol=2e-2), float(jnp.max(jnp.abs(out - ref)))

    print("KERNEL_OK")
</pallas_src>

<mosaic_0001>
module attributes {stable_mosaic.version = 11 : i64} {
  func.func @_outconv_kernel(%arg0: i32, %arg1: memref<2x4x16x16xf32, #tpu.memory_space<vmem>>, %arg2: memref<3x4xf32, #tpu.memory_space<smem>>, %arg3: memref<3xf32, #tpu.memory_space<smem>>, %arg4: memref<32x16xf32, #tpu.memory_space<vmem>>, %arg5: memref<16x32xf32, #tpu.memory_space<vmem>>, %arg6: memref<2x3x32x32xf32, #tpu.memory_space<vmem>>) attributes {dimension_semantics = [#tpu.dimension_semantics<parallel>], iteration_bounds = array<i64: 1>, scalar_prefetch = 0 : i64, scratch_operands = 0 : i64, tpu.core_type = #tpu.core_type<tc>, window_params = [{transform_indices = @transform_0, window_bounds = array<i64: 2, 4, 16, 16>}, {transform_indices = @transform_1, window_bounds = array<i64: 3, 4>}, {transform_indices = @transform_2, window_bounds = array<i64: 3>}, {pipeline_mode = #tpu.pipeline_mode<synchronous>, transform_indices = @transform_3, window_bounds = array<i64: 32, 16>}, {pipeline_mode = #tpu.pipeline_mode<synchronous>, transform_indices = @transform_4, window_bounds = array<i64: 16, 32>}, {transform_indices = @transform_5, window_bounds = array<i64: 2, 3, 32, 32>}]} {
    %c0 = arith.constant 0 : index
    %c0_0 = arith.constant 0 : index
    %0 = vector.load %arg4[%c0, %c0_0] : memref<32x16xf32, #tpu.memory_space<vmem>>, vector<32x16xf32>
    %c0_1 = arith.constant 0 : index
    %c0_2 = arith.constant 0 : index
    %1 = vector.load %arg5[%c0_1, %c0_2] : memref<16x32xf32, #tpu.memory_space<vmem>>, vector<16x32xf32>
    %c0_3 = arith.constant 0 : index
    %c0_4 = arith.constant 0 : index
    %c0_5 = arith.constant 0 : index
    %c0_6 = arith.constant 0 : index
    %2 = vector.load %arg1[%c0_3, %c0_4, %c0_5, %c0_6] : memref<2x4x16x16xf32, #tpu.memory_space<vmem>>, vector<1x1x16x16xf32>
    %3 = vector.shape_cast %2 : vector<1x1x16x16xf32> to vector<16x16xf32>
    %c0_7 = arith.constant 0 : index
    %c0_8 = arith.constant 0 : index
    %4 = memref.load %arg2[%c0_7, %c0_8] : memref<3x4xf32, #tpu.memory_space<smem>>
    %5 = vector.broadcast %4 : f32 to vector<16x16xf32>
    %6 = arith.mulf %3, %5 : vector<16x16xf32>
    %c0_9 = arith.constant 0 : index
    %c1 = arith.constant 1 : index
    %c0_10 = arith.constant 0 : index
    %c0_11 = arith.constant 0 : index
    %7 = vector.load %arg1[%c0_9, %c1, %c0_10, %c0_11] : memref<2x4x16x16xf32, #tpu.memory_space<vmem>>, vector<1x1x16x16xf32>
    %8 = vector.shape_cast %7 : vector<1x1x16x16xf32> to vector<16x16xf32>
    %c0_12 = arith.constant 0 : index
    %c1_13 = arith.constant 1 : index
    %9 = memref.load %arg2[%c0_12, %c1_13] : memref<3x4xf32, #tpu.memory_space<smem>>
    %10 = vector.broadcast %9 : f32 to vector<16x16xf32>
    %11 = arith.mulf %8, %10 : vector<16x16xf32>
    %12 = arith.addf %6, %11 : vector<16x16xf32>
    %c0_14 = arith.constant 0 : index
    %c2 = arith.constant 2 : index
    %c0_15 = arith.constant 0 : index
    %c0_16 = arith.constant 0 : index
    %13 = vector.load %arg1[%c0_14, %c2, %c0_15, %c0_16] : memref<2x4x16x16xf32, #tpu.memory_space<vmem>>, vector<1x1x16x16xf32>
    %14 = vector.shape_cast %13 : vector<1x1x16x16xf32> to vector<16x16xf32>
    %c0_17 = arith.constant 0 : index
    %c2_18 = arith.constant 2 : index
    %15 = memref.load %arg2[%c0_17, %c2_18] : memref<3x4xf32, #tpu.memory_space<smem>>
    %16 = vector.broadcast %15 : f32 to vector<16x16xf32>
    %17 = arith.mulf %14, %16 : vector<16x16xf32>
    %18 = arith.addf %12, %17 : vector<16x16xf32>
    %c0_19 = arith.constant 0 : index
    %c3 = arith.constant 3 : index
    %c0_20 = arith.constant 0 : index
    %c0_21 = arith.constant 0 : index
    %19 = vector.load %arg1[%c0_19, %c3, %c0_20, %c0_21] : memref<2x4x16x16xf32, #tpu.memory_space<vmem>>, vector<1x1x16x16xf32>
    %20 = vector.shape_cast %19 : vector<1x1x16x16xf32> to vector<16x16xf32>
    %c0_22 = arith.constant 0 : index
    %c3_23 = arith.constant 3 : index
    %21 = memref.load %arg2[%c0_22, %c3_23] : memref<3x4xf32, #tpu.memory_space<smem>>
    %22 = vector.broadcast %21 : f32 to vector<16x16xf32>
    %23 = arith.mulf %20, %22 : vector<16x16xf32>
    %24 = arith.addf %18, %23 : vector<16x16xf32>
    %c0_24 = arith.constant 0 : index
    %25 = memref.load %arg3[%c0_24] : memref<3xf32, #tpu.memory_space<smem>>
    %26 = vector.broadcast %25 : f32 to vector<16x16xf32>
    %27 = arith.addf %24, %26 : vector<16x16xf32>
    %cst = arith.constant dense<0.000000e+00> : vector<16x32xf32>
    %28 = tpu.matmul %27, %1, %cst {dimension_numbers = #tpu.dot_dimension_numbers<[1], [0], [0], [1], [0, 0, 1, 1], [], []>} : vector<16x16xf32>, vector<16x32xf32>, vector<16x32xf32> -> vector<16x32xf32>
    %cst_25 = arith.constant dense<0.000000e+00> : vector<32x32xf32>
    %29 = tpu.matmul %0, %28, %cst_25 {dimension_numbers = #tpu.dot_dimension_numbers<[1], [0], [0], [1], [0, 0, 1, 1], [], []>} : vector<32x16xf32>, vector<16x32xf32>, vector<32x32xf32> -> vector<32x32xf32>
    %c0_26 = arith.constant 0 : index
    %c0_27 = arith.constant 0 : index
    %c0_28 = arith.constant 0 : index
    %c0_29 = arith.constant 0 : index
    %30 = vector.load %arg6[%c0_26, %c0_27, %c0_28, %c0_29] : memref<2x3x32x32xf32, #tpu.memory_space<vmem>>, vector<1x1x32x32xf32>
    %31 = vector.shape_cast %30 : vector<1x1x32x32xf32> to vector<32x32xf32>
    %32 = vector.shape_cast %29 : vector<32x32xf32> to vector<1x1x32x32xf32>
    tpu.vector_store %arg6[%c0_26, %c0_27, %c0_28, %c0_29], %32 {strides = array<i32>} : memref<2x3x32x32xf32, #tpu.memory_space<vmem>>, vector<1x1x32x32xf32>,
    %c0_30 = arith.constant 0 : index
    %c0_31 = arith.constant 0 : index
    %c0_32 = arith.constant 0 : index
    %c0_33 = arith.constant 0 : index
    %33 = vector.load %arg1[%c0_30, %c0_31, %c0_32, %c0_33] : memref<2x4x16x16xf32, #tpu.memory_space<vmem>>, vector<1x1x16x16xf32>
    %34 = vector.shape_cast %33 : vector<1x1x16x16xf32> to vector<16x16xf32>
    %c1_34 = arith.constant 1 : index
    %c0_35 = arith.constant 0 : index
    %35 = memref.load %arg2[%c1_34, %c0_35] : memref<3x4xf32, #tpu.memory_space<smem>>
    %36 = vector.broadcast %35 : f32 to vector<16x16xf32>
    %37 = arith.mulf %34, %36 : vector<16x16xf32>
    %c0_36 = arith.constant 0 : index
    %c1_37 = arith.constant 1 : index
    %c0_38 = arith.constant 0 : index
    %c0_39 = arith.constant 0 : index
    %38 = vector.load %arg1[%c0_36, %c1_37, %c0_38, %c0_39] : memref<2x4x16x16xf32, #tpu.memory_space<vmem>>, vector<1x1x16x16xf32>
    %39 = vector.shape_cast %38 : vector<1x1x16x16xf32> to vector<16x16xf32>
    %c1_40 = arith.constant 1 : index
    %c1_41 = arith.constant 1 : index
    %40 = memref.load %arg2[%c1_40, %c1_41] : memref<3x4xf32, #tpu.memory_space<smem>>
    %41 = vector.broadcast %40 : f32 to vector<16x16xf32>
    %42 = arith.mulf %39, %41 : vector<16x16xf32>
    %43 = arith.addf %37, %42 : vector<16x16xf32>
    %c0_42 = arith.constant 0 : index
    %c2_43 = arith.constant 2 : index
    %c0_44 = arith.constant 0 : index
    %c0_45 = arith.constant 0 : index
    %44 = vector.load %arg1[%c0_42, %c2_43, %c0_44, %c0_45] : memref<2x4x16x16xf32, #tpu.memory_space<vmem>>, vector<1x1x16x16xf32>
    %45 = vector.shape_cast %44 : vector<1x1x16x16xf32> to vector<16x16xf32>
    %c1_46 = arith.constant 1 : index
    %c2_47 = arith.constant 2 : index
    %46 = memref.load %arg2[%c1_46, %c2_47] : memref<3x4xf32, #tpu.memory_space<smem>>
    %47 = vector.broadcast %46 : f32 to vector<16x16xf32>
    %48 = arith.mulf %45, %47 : vector<16x16xf32>
    %49 = arith.addf %43, %48 : vector<16x16xf32>
    %c0_48 = arith.constant 0 : index
    %c3_49 = arith.constant 3 : index
    %c0_50 = arith.constant 0 : index
    %c0_51 = arith.constant 0 : index
    %50 = vector.load %arg1[%c0_48, %c3_49, %c0_50, %c0_51] : memref<2x4x16x16xf32, #tpu.memory_space<vmem>>, vector<1x1x16x16xf32>
    %51 = vector.shape_cast %50 : vector<1x1x16x16xf32> to vector<16x16xf32>
    %c1_52 = arith.constant 1 : index
    %c3_53 = arith.constant 3 : index
    %52 = memref.load %arg2[%c1_52, %c3_53] : memref<3x4xf32, #tpu.memory_space<smem>>
    %53 = vector.broadcast %52 : f32 to vector<16x16xf32>
    %54 = arith.mulf %51, %53 : vector<16x16xf32>
    %55 = arith.addf %49, %54 : vector<16x16xf32>
    %c1_54 = arith.constant 1 : index
    %56 = memref.load %arg3[%c1_54] : memref<3xf32, #tpu.memory_space<smem>>
    %57 = vector.broadcast %56 : f32 to vector<16x16xf32>
    %58 = arith.addf %55, %57 : vector<16x16xf32>
    %cst_55 = arith.constant dense<0.000000e+00> : vector<16x32xf32>
    %59 = tpu.matmul %58, %1, %cst_55 {dimension_numbers = #tpu.dot_dimension_numbers<[1], [0], [0], [1], [0, 0, 1, 1], [], []>} : vector<16x16xf32>, vector<16x32xf32>, vector<16x32xf32> -> vector<16x32xf32>
    %cst_56 = arith.constant dense<0.000000e+00> : vector<32x32xf32>
    %60 = tpu.matmul %0, %59, %cst_56 {dimension_numbers = #tpu.dot_dimension_numbers<[1], [0], [0], [1], [0, 0, 1, 1], [], []>} : vector<32x16xf32>, vector<16x32xf32>, vector<32x32xf32> -> vector<32x32xf32>
    %c0_57 = arith.constant 0 : index
    %c1_58 = arith.constant 1 : index
    %c0_59 = arith.constant 0 : index
    %c0_60 = arith.constant 0 : index
    %61 = vector.load %arg6[%c0_57, %c1_58, %c0_59, %c0_60] : memref<2x3x32x32xf32, #tpu.memory_space<vmem>>, vector<1x1x32x32xf32>
    %62 = vector.shape_cast %61 : vector<1x1x32x32xf32> to vector<32x32xf32>
    %63 = vector.shape_cast %60 : vector<32x32xf32> to vector<1x1x32x32xf32>
    tpu.vector_store %arg6[%c0_57, %c1_58, %c0_59, %c0_60], %63 {strides = array<i32>} : memref<2x3x32x32xf32, #tpu.memory_space<vmem>>, vector<1x1x32x32xf32>,
    %c0_61 = arith.constant 0 : index
    %c0_62 = arith.constant 0 : index
    %c0_63 = arith.constant 0 : index
    %c0_64 = arith.constant 0 : index
    %64 = vector.load %arg1[%c0_61, %c0_62, %c0_63, %c0_64] : memref<2x4x16x16xf32, #tpu.memory_space<vmem>>, vector<1x1x16x16xf32>
    %65 = vector.shape_cast %64 : vector<1x1x16x16xf32> to vector<16x16xf32>
    %c2_65 = arith.constant 2 : index
    %c0_66 = arith.constant 0 : index
    %66 = memref.load %arg2[%c2_65, %c0_66] : memref<3x4xf32, #tpu.memory_space<smem>>
    %67 = vector.broadcast %66 : f32 to vector<16x16xf32>
    %68 = arith.mulf %65, %67 : vector<16x16xf32>
    %c0_67 = arith.constant 0 : index
    %c1_68 = arith.constant 1 : index
    %c0_69 = arith.constant 0 : index
    %c0_70 = arith.constant 0 : index
    %69 = vector.load %arg1[%c0_67, %c1_68, %c0_69, %c0_70] : memref<2x4x16x16xf32, #tpu.memory_space<vmem>>, vector<1x1x16x16xf32>
    %70 = vector.shape_cast %69 : vector<1x1x16x16xf32> to vector<16x16xf32>
    %c2_71 = arith.constant 2 : index
    %c1_72 = arith.constant 1 : index
    %71 = memref.load %arg2[%c2_71, %c1_72] : memref<3x4xf32, #tpu.memory_space<smem>>
    %72 = vector.broadcast %71 : f32 to vector<16x16xf32>
    %73 = arith.mulf %70, %72 : vector<16x16xf32>
    %74 = arith.addf %68, %73 : vector<16x16xf32>
    %c0_73 = arith.constant 0 : index
    %c2_74 = arith.constant 2 : index
    %c0_75 = arith.constant 0 : index
    %c0_76 = arith.constant 0 : index
    %75 = vector.load %arg1[%c0_73, %c2_74, %c0_75, %c0_76] : memref<2x4x16x16xf32, #tpu.memory_space<vmem>>, vector<1x1x16x16xf32>
    %76 = vector.shape_cast %75 : vector<1x1x16x16xf32> to vector<16x16xf32>
    %c2_77 = arith.constant 2 : index
    %c2_78 = arith.constant 2 : index
    %77 = memref.load %arg2[%c2_77, %c2_78] : memref<3x4xf32, #tpu.memory_space<smem>>
    %78 = vector.broadcast %77 : f32 to vector<16x16xf32>
    %79 = arith.mulf %76, %78 : vector<16x16xf32>
    %80 = arith.addf %74, %79 : vector<16x16xf32>
    %c0_79 = arith.constant 0 : index
    %c3_80 = arith.constant 3 : index
    %c0_81 = arith.constant 0 : index
    %c0_82 = arith.constant 0 : index
    %81 = vector.load %arg1[%c0_79, %c3_80, %c0_81, %c0_82] : memref<2x4x16x16xf32, #tpu.memory_space<vmem>>, vector<1x1x16x16xf32>
    %82 = vector.shape_cast %81 : vector<1x1x16x16xf32> to vector<16x16xf32>
    %c2_83 = arith.constant 2 : index
    %c3_84 = arith.constant 3 : index
    %83 = memref.load %arg2[%c2_83, %c3_84] : memref<3x4xf32, #tpu.memory_space<smem>>
    %84 = vector.broadcast %83 : f32 to vector<16x16xf32>
    %85 = arith.mulf %82, %84 : vector<16x16xf32>
    %86 = arith.addf %80, %85 : vector<16x16xf32>
    %c2_85 = arith.constant 2 : index
    %87 = memref.load %arg3[%c2_85] : memref<3xf32, #tpu.memory_space<smem>>
    %88 = vector.broadcast %87 : f32 to vector<16x16xf32>
    %89 = arith.addf %86, %88 : vector<16x16xf32>
    %cst_86 = arith.constant dense<0.000000e+00> : vector<16x32xf32>
    %90 = tpu.matmul %89, %1, %cst_86 {dimension_numbers = #tpu.dot_dimension_numbers<[1], [0], [0], [1], [0, 0, 1, 1], [], []>} : vector<16x16xf32>, vector<16x32xf32>, vector<16x32xf32> -> vector<16x32xf32>
    %cst_87 = arith.constant dense<0.000000e+00> : vector<32x32xf32>
    %91 = tpu.matmul %0, %90, %cst_87 {dimension_numbers = #tpu.dot_dimension_numbers<[1], [0], [0], [1], [0, 0, 1, 1], [], []>} : vector<32x16xf32>, vector<16x32xf32>, vector<32x32xf32> -> vector<32x32xf32>
    %c0_88 = arith.constant 0 : index
    %c2_89 = arith.constant 2 : index
    %c0_90 = arith.constant 0 : index
    %c0_91 = arith.constant 0 : index
    %92 = vector.load %arg6[%c0_88, %c2_89, %c0_90, %c0_91] : memref<2x3x32x32xf32, #tpu.memory_space<vmem>>, vector<1x1x32x32xf32>
    %93 = vector.shape_cast %92 : vector<1x1x32x32xf32> to vector<32x32xf32>
    %94 = vector.shape_cast %91 : vector<32x32xf32> to vector<1x1x32x32xf32>
    tpu.vector_store %arg6[%c0_88, %c2_89, %c0_90, %c0_91], %94 {strides = array<i32>} : memref<2x3x32x32xf32, #tpu.memory_space<vmem>>, vector<1x1x32x32xf32>,
    %c1_92 = arith.constant 1 : index
    %c0_93 = arith.constant 0 : index
    %c0_94 = arith.constant 0 : index
    %c0_95 = arith.constant 0 : index
    %95 = vector.load %arg1[%c1_92, %c0_93, %c0_94, %c0_95] : memref<2x4x16x16xf32, #tpu.memory_space<vmem>>, vector<1x1x16x16xf32>
    %96 = vector.shape_cast %95 : vector<1x1x16x16xf32> to vector<16x16xf32>
    %c0_96 = arith.constant 0 : index
    %c0_97 = arith.constant 0 : index
    %97 = memref.load %arg2[%c0_96, %c0_97] : memref<3x4xf32, #tpu.memory_space<smem>>
    %98 = vector.broadcast %97 : f32 to vector<16x16xf32>
    %99 = arith.mulf %96, %98 : vector<16x16xf32>
    %c1_98 = arith.constant 1 : index
    %c1_99 = arith.constant 1 : index
    %c0_100 = arith.constant 0 : index
    %c0_101 = arith.constant 0 : index
    %100 = vector.load %arg1[%c1_98, %c1_99, %c0_100, %c0_101] : memref<2x4x16x16xf32, #tpu.memory_space<vmem>>, vector<1x1x16x16xf32>
    %101 = vector.shape_cast %100 : vector<1x1x16x16xf32> to vector<16x16xf32>
    %c0_102 = arith.constant 0 : index
    %c1_103 = arith.constant 1 : index
    %102 = memref.load %arg2[%c0_102, %c1_103] : memref<3x4xf32, #tpu.memory_space<smem>>
    %103 = vector.broadcast %102 : f32 to vector<16x16xf32>
    %104 = arith.mulf %101, %103 : vector<16x16xf32>
    %105 = arith.addf %99, %104 : vector<16x16xf32>
    %c1_104 = arith.constant 1 : index
    %c2_105 = arith.constant 2 : index
    %c0_106 = arith.constant 0 : index
    %c0_107 = arith.constant 0 : index
    %106 = vector.load %arg1[%c1_104, %c2_105, %c0_106, %c0_107] : memref<2x4x16x16xf32, #tpu.memory_space<vmem>>, vector<1x1x16x16xf32>
    %107 = vector.shape_cast %106 : vector<1x1x16x16xf32> to vector<16x16xf32>
    %c0_108 = arith.constant 0 : index
    %c2_109 = arith.constant 2 : index
    %108 = memref.load %arg2[%c0_108, %c2_109] : memref<3x4xf32, #tpu.memory_space<smem>>
    %109 = vector.broadcast %108 : f32 to vector<16x16xf32>
    %110 = arith.mulf %107, %109 : vector<16x16xf32>
    %111 = arith.addf %105, %110 : vector<16x16xf32>
    %c1_110 = arith.constant 1 : index
    %c3_111 = arith.constant 3 : index
    %c0_112 = arith.constant 0 : index
    %c0_113 = arith.constant 0 : index
    %112 = vector.load %arg1[%c1_110, %c3_111, %c0_112, %c0_113] : memref<2x4x16x16xf32, #tpu.memory_space<vmem>>, vector<1x1x16x16xf32>
    %113 = vector.shape_cast %112 : vector<1x1x16x16xf32> to vector<16x16xf32>
    %c0_114 = arith.constant 0 : index
    %c3_115 = arith.constant 3 : index
    %114 = memref.load %arg2[%c0_114, %c3_115] : memref<3x4xf32, #tpu.memory_space<smem>>
    %115 = vector.broadcast %114 : f32 to vector<16x16xf32>
    %116 = arith.mulf %113, %115 : vector<16x16xf32>
    %117 = arith.addf %111, %116 : vector<16x16xf32>
    %c0_116 = arith.constant 0 : index
    %118 = memref.load %arg3[%c0_116] : memref<3xf32, #tpu.memory_space<smem>>
    %119 = vector.broadcast %118 : f32 to vector<16x16xf32>
    %120 = arith.addf %117, %119 : vector<16x16xf32>
    %cst_117 = arith.constant dense<0.000000e+00> : vector<16x32xf32>
    %121 = tpu.matmul %120, %1, %cst_117 {dimension_numbers = #tpu.dot_dimension_numbers<[1], [0], [0], [1], [0, 0, 1, 1], [], []>} : vector<16x16xf32>, vector<16x32xf32>, vector<16x32xf32> -> vector<16x32xf32>
    %cst_118 = arith.constant dense<0.000000e+00> : vector<32x32xf32>
    %122 = tpu.matmul %0, %121, %cst_118 {dimension_numbers = #tpu.dot_dimension_numbers<[1], [0], [0], [1], [0, 0, 1, 1], [], []>} : vector<32x16xf32>, vector<16x32xf32>, vector<32x32xf32> -> vector<32x32xf32>
    %c1_119 = arith.constant 1 : index
    %c0_120 = arith.constant 0 : index
    %c0_121 = arith.constant 0 : index
    %c0_122 = arith.constant 0 : index
    %123 = vector.load %arg6[%c1_119, %c0_120, %c0_121, %c0_122] : memref<2x3x32x32xf32, #tpu.memory_space<vmem>>, vector<1x1x32x32xf32>
    %124 = vector.shape_cast %123 : vector<1x1x32x32xf32> to vector<32x32xf32>
    %125 = vector.shape_cast %122 : vector<32x32xf32> to vector<1x1x32x32xf32>
    tpu.vector_store %arg6[%c1_119, %c0_120, %c0_121, %c0_122], %125 {strides = array<i32>} : memref<2x3x32x32xf32, #tpu.memory_space<vmem>>, vector<1x1x32x32xf32>,
    %c1_123 = arith.constant 1 : index
    %c0_124 = arith.constant 0 : index
    %c0_125 = arith.constant 0 : index
    %c0_126 = arith.constant 0 : index
    %126 = vector.load %arg1[%c1_123, %c0_124, %c0_125, %c0_126] : memref<2x4x16x16xf32, #tpu.memory_space<vmem>>, vector<1x1x16x16xf32>
    %127 = vector.shape_cast %126 : vector<1x1x16x16xf32> to vector<16x16xf32>
    %c1_127 = arith.constant 1 : index
    %c0_128 = arith.constant 0 : index
    %128 = memref.load %arg2[%c1_127, %c0_128] : memref<3x4xf32, #tpu.memory_space<smem>>
    %129 = vector.broadcast %128 : f32 to vector<16x16xf32>
    %130 = arith.mulf %127, %129 : vector<16x16xf32>
    %c1_129 = arith.constant 1 : index
    %c1_130 = arith.constant 1 : index
    %c0_131 = arith.constant 0 : index
    %c0_132 = arith.constant 0 : index
    %131 = vector.load %arg1[%c1_129, %c1_130, %c0_131, %c0_132] : memref<2x4x16x16xf32, #tpu.memory_space<vmem>>, vector<1x1x16x16xf32>
    %132 = vector.shape_cast %131 : vector<1x1x16x16xf32> to vector<16x16xf32>
    %c1_133 = arith.constant 1 : index
    %c1_134 = arith.constant 1 : index
    %133 = memref.load %arg2[%c1_133, %c1_134] : memref<3x4xf32, #tpu.memory_space<smem>>
    %134 = vector.broadcast %133 : f32 to vector<16x16xf32>
    %135 = arith.mulf %132, %134 : vector<16x16xf32>
    %136 = arith.addf %130, %135 : vector<16x16xf32>
    %c1_135 = arith.constant 1 : index
    %c2_136 = arith.constant 2 : index
    %c0_137 = arith.constant 0 : index
    %c0_138 = arith.constant 0 : index
    %137 = vector.load %arg1[%c1_135, %c2_136, %c0_137, %c0_138] : memref<2x4x16x16xf32, #tpu.memory_space<vmem>>, vector<1x1x16x16xf32>
    %138 = vector.shape_cast %137 : vector<1x1x16x16xf32> to vector<16x16xf32>
    %c1_139 = arith.constant 1 : index
    %c2_140 = arith.constant 2 : index
    %139 = memref.load %arg2[%c1_139, %c2_140] : memref<3x4xf32, #tpu.memory_space<smem>>
    %140 = vector.broadcast %139 : f32 to vector<16x16xf32>
    %141 = arith.mulf %138, %140 : vector<16x16xf32>
    %142 = arith.addf %136, %141 : vector<16x16xf32>
    %c1_141 = arith.constant 1 : index
    %c3_142 = arith.constant 3 : index
    %c0_143 = arith.constant 0 : index
    %c0_144 = arith.constant 0 : index
    %143 = vector.load %arg1[%c1_141, %c3_142, %c0_143, %c0_144] : memref<2x4x16x16xf32, #tpu.memory_space<vmem>>, vector<1x1x16x16xf32>
    %144 = vector.shape_cast %143 : vector<1x1x16x16xf32> to vector<16x16xf32>
    %c1_145 = arith.constant 1 : index
    %c3_146 = arith.constant 3 : index
    %145 = memref.load %arg2[%c1_145, %c3_146] : memref<3x4xf32, #tpu.memory_space<smem>>
    %146 = vector.broadcast %145 : f32 to vector<16x16xf32>
    %147 = arith.mulf %144, %146 : vector<16x16xf32>
    %148 = arith.addf %142, %147 : vector<16x16xf32>
    %c1_147 = arith.constant 1 : index
    %149 = memref.load %arg3[%c1_147] : memref<3xf32, #tpu.memory_space<smem>>
    %150 = vector.broadcast %149 : f32 to vector<16x16xf32>
    %151 = arith.addf %148, %150 : vector<16x16xf32>
    %cst_148 = arith.constant dense<0.000000e+00> : vector<16x32xf32>
    %152 = tpu.matmul %151, %1, %cst_148 {dimension_numbers = #tpu.dot_dimension_numbers<[1], [0], [0], [1], [0, 0, 1, 1], [], []>} : vector<16x16xf32>, vector<16x32xf32>, vector<16x32xf32> -> vector<16x32xf32>
    %cst_149 = arith.constant dense<0.000000e+00> : vector<32x32xf32>
    %153 = tpu.matmul %0, %152, %cst_149 {dimension_numbers = #tpu.dot_dimension_numbers<[1], [0], [0], [1], [0, 0, 1, 1], [], []>} : vector<32x16xf32>, vector<16x32xf32>, vector<32x32xf32> -> vector<32x32xf32>
    %c1_150 = arith.constant 1 : index
    %c1_151 = arith.constant 1 : index
    %c0_152 = arith.constant 0 : index
    %c0_153 = arith.constant 0 : index
    %154 = vector.load %arg6[%c1_150, %c1_151, %c0_152, %c0_153] : memref<2x3x32x32xf32, #tpu.memory_space<vmem>>, vector<1x1x32x32xf32>
    %155 = vector.shape_cast %154 : vector<1x1x32x32xf32> to vector<32x32xf32>
    %156 = vector.shape_cast %153 : vector<32x32xf32> to vector<1x1x32x32xf32>
    tpu.vector_store %arg6[%c1_150, %c1_151, %c0_152, %c0_153], %156 {strides = array<i32>} : memref<2x3x32x32xf32, #tpu.memory_space<vmem>>, vector<1x1x32x32xf32>,
    %c1_154 = arith.constant 1 : index
    %c0_155 = arith.constant 0 : index
    %c0_156 = arith.constant 0 : index
    %c0_157 = arith.constant 0 : index
    %157 = vector.load %arg1[%c1_154, %c0_155, %c0_156, %c0_157] : memref<2x4x16x16xf32, #tpu.memory_space<vmem>>, vector<1x1x16x16xf32>
    %158 = vector.shape_cast %157 : vector<1x1x16x16xf32> to vector<16x16xf32>
    %c2_158 = arith.constant 2 : index
    %c0_159 = arith.constant 0 : index
    %159 = memref.load %arg2[%c2_158, %c0_159] : memref<3x4xf32, #tpu.memory_space<smem>>
    %160 = vector.broadcast %159 : f32 to vector<16x16xf32>
    %161 = arith.mulf %158, %160 : vector<16x16xf32>
    %c1_160 = arith.constant 1 : index
    %c1_161 = arith.constant 1 : index
    %c0_162 = arith.constant 0 : index
    %c0_163 = arith.constant 0 : index
    %162 = vector.load %arg1[%c1_160, %c1_161, %c0_162, %c0_163] : memref<2x4x16x16xf32, #tpu.memory_space<vmem>>, vector<1x1x16x16xf32>
    %163 = vector.shape_cast %162 : vector<1x1x16x16xf32> to vector<16x16xf32>
    %c2_164 = arith.constant 2 : index
    %c1_165 = arith.constant 1 : index
    %164 = memref.load %arg2[%c2_164, %c1_165] : memref<3x4xf32, #tpu.memory_space<smem>>
    %165 = vector.broadcast %164 : f32 to vector<16x16xf32>
    %166 = arith.mulf %163, %165 : vector<16x16xf32>
    %167 = arith.addf %161, %166 : vector<16x16xf32>
    %c1_166 = arith.constant 1 : index
    %c2_167 = arith.constant 2 : index
    %c0_168 = arith.constant 0 : index
    %c0_169 = arith.constant 0 : index
    %168 = vector.load %arg1[%c1_166, %c2_167, %c0_168, %c0_169] : memref<2x4x16x16xf32, #tpu.memory_space<vmem>>, vector<1x1x16x16xf32>
    %169 = vector.shape_cast %168 : vector<1x1x16x16xf32> to vector<16x16xf32>
    %c2_170 = arith.constant 2 : index
    %c2_171 = arith.constant 2 : index
    %170 = memref.load %arg2[%c2_170, %c2_171] : memref<3x4xf32, #tpu.memory_space<smem>>
    %171 = vector.broadcast %170 : f32 to vector<16x16xf32>
    %172 = arith.mulf %169, %171 : vector<16x16xf32>
    %173 = arith.addf %167, %172 : vector<16x16xf32>
    %c1_172 = arith.constant 1 : index
    %c3_173 = arith.constant 3 : index
    %c0_174 = arith.constant 0 : index
    %c0_175 = arith.constant 0 : index
    %174 = vector.load %arg1[%c1_172, %c3_173, %c0_174, %c0_175] : memref<2x4x16x16xf32, #tpu.memory_space<vmem>>, vector<1x1x16x16xf32>
    %175 = vector.shape_cast %174 : vector<1x1x16x16xf32> to vector<16x16xf32>
    %c2_176 = arith.constant 2 : index
    %c3_177 = arith.constant 3 : index
    %176 = memref.load %arg2[%c2_176, %c3_177] : memref<3x4xf32, #tpu.memory_space<smem>>
    %177 = vector.broadcast %176 : f32 to vector<16x16xf32>
    %178 = arith.mulf %175, %177 : vector<16x16xf32>
    %179 = arith.addf %173, %178 : vector<16x16xf32>
    %c2_178 = arith.constant 2 : index
    %180 = memref.load %arg3[%c2_178] : memref<3xf32, #tpu.memory_space<smem>>
    %181 = vector.broadcast %180 : f32 to vector<16x16xf32>
    %182 = arith.addf %179, %181 : vector<16x16xf32>
    %cst_179 = arith.constant dense<0.000000e+00> : vector<16x32xf32>
    %183 = tpu.matmul %182, %1, %cst_179 {dimension_numbers = #tpu.dot_dimension_numbers<[1], [0], [0], [1], [0, 0, 1, 1], [], []>} : vector<16x16xf32>, vector<16x32xf32>, vector<16x32xf32> -> vector<16x32xf32>
    %cst_180 = arith.constant dense<0.000000e+00> : vector<32x32xf32>
    %184 = tpu.matmul %0, %183, %cst_180 {dimension_numbers = #tpu.dot_dimension_numbers<[1], [0], [0], [1], [0, 0, 1, 1], [], []>} : vector<32x16xf32>, vector<16x32xf32>, vector<32x32xf32> -> vector<32x32xf32>
    %c1_181 = arith.constant 1 : index
    %c2_182 = arith.constant 2 : index
    %c0_183 = arith.constant 0 : index
    %c0_184 = arith.constant 0 : index
    %185 = vector.load %arg6[%c1_181, %c2_182, %c0_183, %c0_184] : memref<2x3x32x32xf32, #tpu.memory_space<vmem>>, vector<1x1x32x32xf32>
    %186 = vector.shape_cast %185 : vector<1x1x32x32xf32> to vector<32x32xf32>
    %187 = vector.shape_cast %184 : vector<32x32xf32> to vector<1x1x32x32xf32>
    tpu.vector_store %arg6[%c1_181, %c2_182, %c0_183, %c0_184], %187 {strides = array<i32>} : memref<2x3x32x32xf32, #tpu.memory_space<vmem>>, vector<1x1x32x32xf32>,
    return
  }
  func.func @transform_0(%arg0: i32) -> (i32, i32, i32, i32) {
    %c0_i32 = arith.constant 0 : i32
    %c0_i32_0 = arith.constant 0 : i32
    %c0_i32_1 = arith.constant 0 : i32
    %c0_i32_2 = arith.constant 0 : i32
    return %arg0, %c0_i32, %c0_i32_0, %c0_i32_1 : i32, i32, i32, i32
  }
  func.func @transform_1(%arg0: i32) -> (i32, i32) {
    %c0_i32 = arith.constant 0 : i32
    %c0_i32_0 = arith.constant 0 : i32
    %c0_i32_1 = arith.constant 0 : i32
    return %c0_i32, %c0_i32_0 : i32, i32
  }
  func.func @transform_2(%arg0: i32) -> i32 {
    %c0_i32 = arith.constant 0 : i32
    %c0_i32_0 = arith.constant 0 : i32
    return %c0_i32 : i32
  }
  func.func @transform_3(%arg0: i32) -> (i32, i32) {
    %c0_i32 = arith.constant 0 : i32
    %c0_i32_0 = arith.constant 0 : i32
    %c0_i32_1 = arith.constant 0 : i32
    return %c0_i32, %c0_i32_0 : i32, i32
  }
  func.func @transform_4(%arg0: i32) -> (i32, i32) {
    %c0_i32 = arith.constant 0 : i32
    %c0_i32_0 = arith.constant 0 : i32
    %c0_i32_1 = arith.constant 0 : i32
    return %c0_i32, %c0_i32_0 : i32, i32
  }
  func.func @transform_5(%arg0: i32) -> (i32, i32, i32, i32) {
    %c0_i32 = arith.constant 0 : i32
    %c0_i32_0 = arith.constant 0 : i32
    %c0_i32_1 = arith.constant 0 : i32
    %c0_i32_2 = arith.constant 0 : i32
    return %arg0, %c0_i32, %c0_i32_0, %c0_i32_1 : i32, i32, i32, i32
  }
}

</mosaic_0001>

<bundles_post_ra>
// kernel: tpu_custom_call.1
= control target key start
LH: loop header
LB: loop body
LE: loop exit
PB: predicated region body
PF: predicated region fallthrough
CT: control target
= control target key end

     0   :  { %10 = vsyncpa [#allocation3], 0  ;;  %s2055_s0 = inlined_call_operand.hbm [shape: f32[2,4,16,16], index: 0, kind: input, shape index: {}]   ;;  %s2056_s1 = inlined_call_operand.vmem [shape: f32[3,4], index: 1, kind: input, shape index: {}]   ;;  %s2057_s2 = inlined_call_operand.vmem [shape: f32[3], index: 2, kind: input, shape index: {}]   ;;  %s2058_s3 = inlined_call_operand.vmem [shape: f32[32,16], index: 3, kind: input, shape index: {}]   ;;  %s2059_s4 = inlined_call_operand.vmem [shape: f32[16,32], index: 4, kind: input, shape index: {}]   ;;  %s2060_s5 = inlined_call_operand.hbm [shape: f32[2,3,32,32], index: 5, kind: output, shape index: {}]  }
   0x1   :  { %11 = vsyncpa [#allocation5], 0 }
   0x2   :  { %12 = vsyncpa [#allocation8], 0 }
   0x3   :  { %13 = vsyncpa [#allocation4], 0  ;;  %s1689_s18 = smov [#allocation2]   ;;  %s32_s22 = sshll.u32 %s2056_s1, 4  ;;  %s33_s22 = int_to_ptr.vmem [resolvable:$true] %s32_s22 }
   0x4   :  { %s19_s19 = sshll.u32 %s1689_s18, 4  ;;  %s1613_s25 = scalar_lea.hbm %s2055_s0, 2048  ;;  %s20_s19 = int_to_ptr.vmem [resolvable:$true] %s19_s19 }
   0x5   :  { %p1614_p0 = scmp.ne.s32.totalorder %s2055_s0, %s1613_s25  ;;  %p1617_p1 = scmp.lt.u32.totalorder %s1613_s25, %s2055_s0 }
   0x7   :  { %p1619_p2 = pnand %p1617_p1, %p1614_p0 }
   0x9   :  { %1622 = shalt.err (!%p1619_p2)
}
   0xa   :  { %s1623_s30 = scalar_lea.vmem %s20_s19, 2048  ;;  %p1628_p4 = scmp.lt.s32.totalorder %s20_s19, %s20_s19 }
   0xb   :  { %p1624_p3 = scmp.ne.s32.totalorder %s20_s19, %s1623_s30  ;;  %p1629_p5 = scmp.lt.s32.totalorder %s1623_s30, %s1623_s30 }
   0xd   :  { %p1630_p6 = por %p1629_p5, %p1628_p4 }
   0xf   :  { %p1631_p7 = pnand %p1630_p6, %p1624_p3 }
  0x11   :  { %1634 = shalt.err (!%p1631_p7)
}
  0x12   :  { %s1690_s1 = smov 128   ;;  %s1691_s6 = smov 8  }
  0x13   :  { %25 = dma.hbm_to_vmem [thread:$0]  %s2055_s0, 2048, %s20_s19, [#allocation3], %s1690_s1, %s1690_s1, %s1691_s6  }
  0x14   :  { %s1635_s9 = scalar_lea.vmem %s33_s22, 64  ;;  %p1640_p9 = scmp.lt.s32.totalorder %s33_s22, %s33_s22 }
  0x15   :  { %p1636_p8 = scmp.ne.s32.totalorder %s33_s22, %s1635_s9  ;;  %p1641_p10 = scmp.lt.s32.totalorder %s1635_s9, %s1635_s9 }
  0x17   :  { %p1642_p11 = por %p1641_p10, %p1640_p9 }
  0x19   :  { %p1643_p12 = pnand %p1642_p11, %p1636_p8 }
  0x1b   :  { %1646 = shalt.err (!%p1643_p12)
}
  0x1c   :  { %s1692_s10 = smov [#allocation6]   ;;  %s42_s13 = sshll.u32 %s2057_s2, 4  ;;  %s43_s13 = int_to_ptr.vmem [resolvable:$true] %s42_s13 }
  0x1d   :  { %35 = dma.vmem_to_smem %s33_s22, 64, %s1692_s10, [#allocation5]  }
  0x1e   :  { %s1647_s14 = scalar_lea.vmem %s43_s13, 16  ;;  %p1652_p0 = scmp.lt.s32.totalorder %s43_s13, %s43_s13 }
  0x1f   :  { %p1648_p13 = scmp.ne.s32.totalorder %s43_s13, %s1647_s14  ;;  %p1653_p1 = scmp.lt.s32.totalorder %s1647_s14, %s1647_s14 }
  0x21   :  { %p1654_p2 = por %p1653_p1, %p1652_p0 }
  0x23   :  { %p1655_p3 = pnand %p1654_p2, %p1648_p13 }
  0x25   :  { %1658 = shalt.err (!%p1655_p3)
}
  0x26   :  { %s1693_s0 = smov [#allocation7]  }
  0x27   :  { %45 = dma.vmem_to_smem %s43_s13, 16, %s1693_s0, [#allocation8]  }
  0x28   :  { %1681 = dma.done.wait [#allocation3], 2048  }
  0x29   :  { %1682 = vsyncadd [#allocation3], 4294965248 }
  0x2a   :  { %1683 = dma.done.wait [#allocation5], 64  }
  0x2b   :  { %1684 = vsyncadd [#allocation5], 4294967232 }
  0x2c   :  { %1685 = dma.done.wait [#allocation8], 16  }
  0x2d   :  { %1686 = vsyncadd [#allocation8], 4294967280 }
  0x2e   :  { %59 = sfence }
  0x2f   :  { %v64_v0 = vld [vmem:[%s2059_s4] sm:$0xff]  ;;  %v65_v1 = vld [vmem:[%s2059_s4 + $0x8] sm:$0xff]  ;;  %s68_s18 = sld [smem:[#allocation6]]  ;;  %s1335_s19 = sld [smem:[#allocation6 + $0x1]]  ;;  %v1762_v5 = vld [vmem:[#allocation2 + $0x10] sm:$0xff]  ;;  %vm103_vm0 = vcmask 130048  }
  0x30   :  { %v1752_v2 = vpack.c.bf16 %v65_v1, %v64_v0  ;;  %s1336_s20 = sld [smem:[#allocation6 + $0x2]]  ;;  %s1337_s21 = sld [smem:[#allocation6 + $0x3]]  ;;  %v1758_v3 = vld [vmem:[#allocation2] sm:$0xff]  ;;  %v1760_v4 = vld [vmem:[#allocation2 + $0x8] sm:$0xff]  ;;  %v1764_v6 = vld [vmem:[#allocation2 + $0x18] sm:$0xff]  ;;  %vm282_vm1 = vcmask 261120  }
  0x31   :  { %s99_s22 = sld [smem:[#allocation7]]  ;;  %s1345_s23 = sld [smem:[#allocation6 + $0x81]]  ;;  %v1768_v8 = vld [vmem:[#allocation2 + $0x20] sm:$0xff]  ;;  %v1770_v9 = vld [vmem:[#allocation2 + $0x28] sm:$0xff]  ;;  %v1778_v13 = vld [vmem:[#allocation2 + $0x30] sm:$0xff] }
  0x32   :  { %1560 = vmatprep.subr.bf16.mxu1 %v1752_v2  ;;  %1568 = vmatprep.subr.bf16.mxu0 %v1752_v2  ;;  %s1344_s4 = sld [smem:[#allocation6 + $0x80]]  ;;  %s1346_s24 = sld [smem:[#allocation6 + $0x82]]  ;;  %v1780_v14 = vld [vmem:[#allocation2 + $0x38] sm:$0xff]  ;;  %v1837_v53 = vld [vmem:[%s2058_s3] sm:$0xff]  ;;  %v1855_v60 = vld [vmem:[#allocation2 + $0x50] sm:$0xff] }
  0x33   :  { %1562 = vmatpush3.bf16.msra.mxu1 %v1752_v2  ;;  %1570 = vmatpush3.bf16.msra.mxu0 %v1752_v2  ;;  %s1347_s25 = sld [smem:[#allocation6 + $0x83]]  ;;  %s1348_s26 = sld [smem:[#allocation7 + $0x1]]  ;;  %v1853_v59 = vld [vmem:[#allocation2 + $0x40] sm:$0xff] }
  0x34   :  { %s1355_s29 = sld [smem:[#allocation6 + $0x100]]  ;;  %s1356_s30 = sld [smem:[#allocation6 + $0x101]] }
  0x35   :  { %v1766_v7 = vstv %s68_s18  ;;  %v1776_v12 = vstv %s1335_s19  ;;  %s1357_s7 = sld [smem:[#allocation6 + $0x102]]  ;;  %s1358_s8 = sld [smem:[#allocation6 + $0x103]] }
  0x36   :  { %v70_v10 = vmul.f32 %v1766_v7, %v1758_v3  ;;  %v71_v11 = vmul.f32 %v1766_v7, %v1760_v4  ;;  %v77_v15 = vmul.f32 %v1776_v12, %v1762_v5  ;;  %v78_v16 = vmul.f32 %v1776_v12, %v1764_v6  ;;  %s1359_s9 = sld [smem:[#allocation7 + $0x2]] }
  0x37   :  { %v1786_v17 = vstv %s1336_s20  ;;  %v1792_v20 = vstv %s1337_s21  ;;  %v1794_v21 = vstv %s99_s22  ;;  %v1802_v27 = vstv %s1345_s23 }
  0x38   :  { %v86_v18 = vmul.f32 %v1786_v17, %v1768_v8  ;;  %v87_v19 = vmul.f32 %v1786_v17, %v1770_v9  ;;  %v79_v22 = vadd.f32 %v77_v15, %v70_v10  ;;  %v80_v23 = vadd.f32 %v78_v16, %v71_v11  ;;  %v1869_v10 = vld [vmem:[#allocation2 + $0x58] sm:$0xff]  ;;  %v1873_v11 = vld [vmem:[#allocation2 + $0x60] sm:$0xff] }
  0x39   :  { %v95_v24 = vmul.f32 %v1792_v20, %v1778_v13  ;;  %v96_v25 = vmul.f32 %v1792_v20, %v1780_v14  ;;  %v1800_v26 = vstv %s1344_s4  ;;  %v1804_v28 = vstv %s1346_s24 }
  0x3a   :  { %v1806_v29 = vstv %s1347_s25  ;;  %v88_v30 = vadd.f32 %v86_v18, %v79_v22  ;;  %v89_v31 = vadd.f32 %v87_v19, %v80_v23  ;;  %v291_v32 = vmul.f32 %v1800_v26, %v1758_v3 }
  0x3b   :  { %v292_v33 = vmul.f32 %v1800_v26, %v1760_v4  ;;  %v297_v34 = vmul.f32 %v1802_v27, %v1762_v5  ;;  %v298_v35 = vmul.f32 %v1802_v27, %v1764_v6  ;;  %v305_v36 = vmul.f32 %v1804_v28, %v1768_v8 }
  0x3c   :  { %v306_v37 = vmul.f32 %v1804_v28, %v1770_v9  ;;  %v97_v38 = vadd.f32 %v95_v24, %v88_v30  ;;  %v98_v39 = vadd.f32 %v96_v25, %v89_v31  ;;  %v313_v42 = vmul.f32 %v1806_v29, %v1778_v13  ;;  %v1883_v30 = vld [vmem:[#allocation2 + $0x68] sm:$0xff] }
  0x3d   :  { %v299_v40 = vadd.f32 %v297_v34, %v291_v32  ;;  %v300_v41 = vadd.f32 %v298_v35, %v292_v33  ;;  %v314_v43 = vmul.f32 %v1806_v29, %v1780_v14  ;;  %v1827_v48 = vstv %s1348_s26  ;;  %v1887_v32 = vld [vmem:[#allocation2 + $0x70] sm:$0xff] }
  0x3e   :  { %v101_v44 = vadd.f32 %v1794_v21, %v97_v38  ;;  %v102_v45 = vadd.f32 %v1794_v21, %v98_v39  ;;  %v1843_v54 = vstv %s1355_s29  ;;  %v1845_v55 = vstv %s1356_s30  ;;  %v1901_v39 = vld [vmem:[#allocation2 + $0x78] sm:$0xff] }
  0x3f   :  { %v307_v46 = vadd.f32 %v305_v36, %v299_v40  ;;  %v308_v47 = vadd.f32 %v306_v37, %v300_v41  ;;  %v496_v56 = vmul.f32 %v1843_v54, %v1758_v3  ;;  %v502_v57 = vmul.f32 %v1845_v55, %v1762_v5  ;;  %v1865_v3 = vld [vmem:[#allocation2 + $0x48] sm:$0xff]  ;;  %v1908_v41 = vld [vmem:[%s2058_s3 + $0x10] sm:$0xff] }
  0x40   :  { %1461 = vmatprep.mubr.msk.f32.mxu1 %vm103_vm0, %v101_v44  ;;  %v1851_v58 = vstv %s1357_s7  ;;  %v497_v61 = vmul.f32 %v1843_v54, %v1760_v4  ;;  %v503_v62 = vmul.f32 %v1845_v55, %v1764_v6  ;;  %v1863_v1 = vstv %s1358_s8 }
  0x41   :  { %v315_v49 = vadd.f32 %v313_v42, %v307_v46  ;;  %v316_v50 = vadd.f32 %v314_v43, %v308_v47  ;;  %1462 = vmatmul.mubr.msk.f32.vlgmr.msra.gmra.mrb[0].mxu1 %vm103_vm0, %v102_v45  ;;  %v504_v63 = vadd.f32 %v502_v57, %v496_v56  ;;  %v510_v0 = vmul.f32 %v1851_v58, %v1768_v8  ;;  %v1916_v42 = vld [vmem:[%s2058_s3 + $0x18] sm:$0xff] }
  0x42   :  { %1468 = vmatprep.mubr.msk.f32.mxu1 %vm103_vm0, %v1837_v53  ;;  %v702_v5 = vmul.f32 %v1853_v59, %v1766_v7  ;;  %v709_v4 = vmul.f32 %v1855_v60, %v1776_v12  ;;  %v505_v15 = vadd.f32 %v503_v62, %v497_v61  ;;  %v511_v8 = vmul.f32 %v1851_v58, %v1770_v9 }
  0x43   :  { %v319_v51 = vadd.f32 %v1827_v48, %v315_v49  ;;  %v320_v52 = vadd.f32 %v1827_v48, %v316_v50  ;;  %v512_v18 = vadd.f32 %v510_v0, %v504_v63  ;;  %v518_v19 = vmul.f32 %v1863_v1, %v1778_v13 }
  0x44   :  { %v703_v22 = vmul.f32 %v1865_v3, %v1766_v7  ;;  %v710_v23 = vmul.f32 %v1869_v10, %v1776_v12  ;;  %v711_v25 = vadd.f32 %v709_v4, %v702_v5  ;;  %v718_v31 = vmul.f32 %v1873_v11, %v1786_v17  ;;  %v1894_v7 = vld [vmem:[%s2058_s3 + $0x8] sm:$0xff]  ;;  %s1694_s3 = smov [#allocation9]  }
  0x45   :  { %1478 = vmatprep.mubr.msk.f32.mxu0 %vm103_vm0, %v319_v51  ;;  %v513_v9 = vadd.f32 %v511_v8, %v505_v15  ;;  %v519_v13 = vmul.f32 %v1863_v1, %v1780_v14  ;;  %v520_v12 = vadd.f32 %v518_v19, %v512_v18  ;;  %v719_v35 = vmul.f32 %v1883_v30, %v1786_v17  ;;  %s1321_s15 = sshll.u32 %s1694_s3, 4  ;;  %s1322_s15 = int_to_ptr.vmem [resolvable:$true] %s1321_s15 }
  0x46   :  { %1479 = vmatmul.mubr.msk.f32.vlgmr.msra.gmra.mrb[0].mxu0 %vm103_vm0, %v320_v52  ;;  %v712_v34 = vadd.f32 %v710_v23, %v703_v22  ;;  %v1899_v37 = vstv %s1359_s9  ;;  %v720_v38 = vadd.f32 %v718_v31, %v711_v25  ;;  %v727_v14 = vmul.f32 %v1887_v32, %v1792_v20  ;;  %s1659_s16 = scalar_lea.vmem %s1322_s15, 3072  ;;  %p1664_p5 = scmp.lt.s32.totalorder %s1322_s15, %s1322_s15 }
  0x47   :  { %1485 = vmatprep.mubr.msk.f32.mxu0 %vm103_vm0, %v1837_v53  ;;  %v521_v17 = vadd.f32 %v519_v13, %v513_v9  ;;  %v524_v43 = vadd.f32 %v1899_v37, %v520_v12  ;;  %v728_v45 = vmul.f32 %v1901_v39, %v1792_v20  ;;  %v910_v56 = vmul.f32 %v1853_v59, %v1800_v26  ;;  %p1660_p4 = scmp.ne.s32.totalorder %s1322_s15, %s1659_s16  ;;  %p1665_p6 = scmp.lt.s32.totalorder %s1659_s16, %s1659_s16 }
  0x48   :  { %v721_v44 = vadd.f32 %v719_v35, %v712_v34  ;;  %v729_v46 = vadd.f32 %v727_v14, %v720_v38  ;;  %v911_v61 = vmul.f32 %v1865_v3, %v1800_v26  ;;  %v917_v62 = vmul.f32 %v1869_v10, %v1802_v27 }
  0x49   :  { %v525_v47 = vadd.f32 %v1899_v37, %v521_v17  ;;  %v924_v4 = vmul.f32 %v1873_v11, %v1804_v28  ;;  %v1115_v15 = vmul.f32 %v1853_v59, %v1843_v54  ;;  %v1121_v26 = vmul.f32 %v1855_v60, %v1845_v55  ;;  %p1666_p7 = por %p1665_p6, %p1664_p5 }
  0x4a   :  { %v730_v49 = vadd.f32 %v728_v45, %v721_v44  ;;  %v733_v20 = vadd.f32 %v729_v46, %v1794_v21  ;;  %v919_v8 = vadd.f32 %v917_v62, %v911_v61  ;;  %v932_v23 = vmul.f32 %v1887_v32, %v1806_v29 }
  0x4b   :  { %v1122_v59 = vmul.f32 %v1869_v10, %v1845_v55  ;;  %v1123_v31 = vadd.f32 %v1121_v26, %v1115_v15  ;;  %v933_v13 = vmul.f32 %v1901_v39, %v1806_v29  ;;  %v1130_v55 = vmul.f32 %v1883_v30, %v1851_v58  ;;  %p1667_p8 = pnand %p1666_p7, %p1660_p4 }
  0x4c   :  { %v734_v50 = vadd.f32 %v730_v49, %v1794_v21  ;;  %v916_v21 = vmul.f32 %v1855_v60, %v1802_v27 }
  0x4e   :  { %v918_v5 = vadd.f32 %v916_v21, %v910_v56 }
  0x50   :  { %v926_v22 = vadd.f32 %v924_v4, %v918_v5 }
 0x114   :  { %v1463_v6 = vpop.f32.mrb[0].mxu1 }
 0x115   :  { %v176_v16 = vpop.f32.mrb[1].mxu1 }
 0x116   :  { %v1563_v24 = vpack.c.bf16 %v1463_v6, %v176_v16  ;;  %v925_v16 = vmul.f32 %v1883_v30, %v1804_v28  ;;  %v1129_v28 = vmul.f32 %v1873_v11, %v1851_v58  ;;  %v1137_v11 = vmul.f32 %v1887_v32, %v1863_v1 }
 0x117   :  { %v1138_v58 = vmul.f32 %v1901_v39, %v1863_v1 }
 0x118   :  { %1564 = vmatprep.subr.bf16.mxu1 %v1563_v24  ;;  %v927_v9 = vadd.f32 %v925_v16, %v919_v8  ;;  %v1131_v12 = vadd.f32 %v1129_v28, %v1123_v31 }
 0x119   :  { %v1480_v33 = vpop.f32.mrb[0].mxu0  ;;  %1566 = vmatpush3.bf16.msra.mxu1 %v1563_v24  ;;  %v1116_v24 = vmul.f32 %v1865_v3, %v1843_v54  ;;  %v934_v54 = vadd.f32 %v932_v23, %v926_v22 }
 0x11a   :  { %v393_v36 = vpop.f32.mrb[1].mxu0  ;;  %1576 = vmatprep.subr.bf16.mxu1 %v1752_v2  ;;  %v935_v35 = vadd.f32 %v933_v13, %v927_v9  ;;  %v1139_v30 = vadd.f32 %v1137_v11, %v1131_v12 }
 0x11b   :  { %v1571_v40 = vpack.c.bf16 %v1480_v33, %v393_v36  ;;  %v1124_v3 = vadd.f32 %v1122_v59, %v1116_v24  ;;  %v938_v29 = vadd.f32 %v934_v54, %v1827_v48 }
 0x11c   :  { %1469 = vmatmul.mubr.msk.f32.vlgmr.msra.gmra.mrb[2].mxu1 %vm103_vm0, %v1894_v7  ;;  %v939_v32 = vadd.f32 %v935_v35, %v1827_v48  ;;  %v1143_v1 = vadd.f32 %v1139_v30, %v1899_v37 }
 0x11d   :  { %1572 = vmatprep.subr.bf16.mxu0 %v1571_v40  ;;  %1578 = vmatpush3.bf16.msra.mxu1 %v1752_v2  ;;  %v1132_v36 = vadd.f32 %v1130_v55, %v1124_v3 }
 0x11e   :  { %1574 = vmatpush3.bf16.msra.mxu0 %v1571_v40  ;;  %1471 = vmatprep.mubr.msk.f32.mxu1 %vm103_vm0, %v1908_v41 }
 0x11f   :  { %1584 = vmatprep.subr.bf16.mxu0 %v1752_v2  ;;  %v1140_v38 = vadd.f32 %v1138_v58, %v1132_v36 }
 0x120   :  { %1472 = vmatmul.mubr.msk.f32.gmra.mrb[4].mxu1 %vm103_vm0, %v1916_v42 }
 0x121   :  { %1486 = vmatmul.mubr.msk.f32.vlgmr.msra.gmra.mrb[2].mxu0 %vm103_vm0, %v1894_v7  ;;  %1495 = vmatprep.mubr.msk.f32.mxu1 %vm103_vm0, %v524_v43  ;;  %v1144_v48 = vadd.f32 %v1140_v38, %v1899_v37 }
 0x122   :  { %1586 = vmatpush3.bf16.msra.mxu0 %v1752_v2  ;;  %1488 = vmatprep.mubr.msk.f32.mxu0 %vm103_vm0, %v1908_v41 }
 0x124   :  { %1496 = vmatmul.mubr.msk.f32.vlgmr.msra.gmra.mrb[6].mxu1 %vm103_vm0, %v525_v47 }
 0x125   :  { %1489 = vmatmul.mubr.msk.f32.gmra.mrb[4].mxu0 %vm103_vm0, %v1916_v42  ;;  %1502 = vmatprep.mubr.msk.f32.mxu1 %vm103_vm0, %v1837_v53 }
 0x126   :  { %1512 = vmatprep.mubr.msk.f32.mxu0 %vm103_vm0, %v733_v20 }
 0x129   :  { %1513 = vmatmul.mubr.msk.f32.vlgmr.msra.gmra.mrb[6].mxu0 %vm103_vm0, %v734_v50 }
 0x12a   :  { %1519 = vmatprep.mubr.msk.f32.mxu0 %vm103_vm0, %v1837_v53 }
 0x1ef   :  { %v1470_v51 = vpop.f32.mrb[2].mxu1 }
 0x1f0   :  { %284 = vst.msk [vmem:[#allocation9 + $0x8] sm:$0xff] %vm282_vm1, %v1470_v51  ;;  %v263_v52 = vpop.f32.mrb[3].mxu1 }
 0x1f1   :  { %283 = vst.msk [vmem:[#allocation9] sm:$0xff] %vm282_vm1, %v263_v52 }
 0x1f3   :  { %v1473_v57 = vpop.f32.mrb[4].mxu1 }
 0x1f4   :  { %v1487_v63 = vpop.f32.mrb[2].mxu0  ;;  %286 = vst.msk [vmem:[#allocation9 + $0x18] sm:$0xff] %vm282_vm1, %v1473_v57  ;;  %v273_v0 = vpop.f32.mrb[5].mxu1 }
 0x1f5   :  { %489 = vst.msk [vmem:[#allocation9 + $0x28] sm:$0xff] %vm282_vm1, %v1487_v63  ;;  %v468_v6 = vpop.f32.mrb[3].mxu0  ;;  %285 = vst.msk [vmem:[#allocation9 + $0x10] sm:$0xff] %vm282_vm1, %v273_v0 }
 0x1f6   :  { %488 = vst.msk [vmem:[#allocation9 + $0x20] sm:$0xff] %vm282_vm1, %v468_v6 }
 0x1f7   :  { %v1497_v27 = vpop.f32.mrb[6].mxu1 }
 0x1f8   :  { %v1490_v18 = vpop.f32.mrb[4].mxu0  ;;  %v598_v19 = vpop.f32.mrb[7].mxu1 }
 0x1f9   :  { %491 = vst.msk [vmem:[#allocation9 + $0x38] sm:$0xff] %vm282_vm1, %v1490_v18  ;;  %v478_v60 = vpop.f32.mrb[5].mxu0  ;;  %v1579_v25 = vpack.c.bf16 %v1497_v27, %v598_v19 }
 0x1fa   :  { %490 = vst.msk [vmem:[#allocation9 + $0x30] sm:$0xff] %vm282_vm1, %v478_v60 }
 0x1fb   :  { %1580 = vmatprep.subr.bf16.mxu1 %v1579_v25 }
 0x1fc   :  { %v1514_v33 = vpop.f32.mrb[6].mxu0  ;;  %1582 = vmatpush3.bf16.msra.mxu1 %v1579_v25 }
 0x1fd   :  { %v807_v10 = vpop.f32.mrb[7].mxu0  ;;  %1592 = vmatprep.subr.bf16.mxu1 %v1752_v2 }
 0x1fe   :  { %v1587_v34 = vpack.c.bf16 %v1514_v33, %v807_v10 }
 0x1ff   :  { %1503 = vmatmul.mubr.msk.f32.vlgmr.msra.gmra.mrb[8].mxu1 %vm103_vm0, %v1894_v7 }
 0x200   :  { %1588 = vmatprep.subr.bf16.mxu0 %v1587_v34  ;;  %1594 = vmatpush3.bf16.msra.mxu1 %v1752_v2 }
 0x201   :  { %1590 = vmatpush3.bf16.msra.mxu0 %v1587_v34  ;;  %1505 = vmatprep.mubr.msk.f32.mxu1 %vm103_vm0, %v1908_v41 }
 0x202   :  { %1600 = vmatprep.subr.bf16.mxu0 %v1752_v2 }
 0x203   :  { %1506 = vmatmul.mubr.msk.f32.gmra.mrb[10].mxu1 %vm103_vm0, %v1916_v42 }
 0x204   :  { %1520 = vmatmul.mubr.msk.f32.vlgmr.msra.gmra.mrb[8].mxu0 %vm103_vm0, %v1894_v7  ;;  %1529 = vmatprep.mubr.msk.f32.mxu1 %vm103_vm0, %v938_v29 }
 0x205   :  { %1602 = vmatpush3.bf16.msra.mxu0 %v1752_v2  ;;  %1522 = vmatprep.mubr.msk.f32.mxu0 %vm103_vm0, %v1908_v41 }
 0x207   :  { %1530 = vmatmul.mubr.msk.f32.vlgmr.msra.gmra.mrb[12].mxu1 %vm103_vm0, %v939_v32 }
 0x208   :  { %1523 = vmatmul.mubr.msk.f32.gmra.mrb[10].mxu0 %vm103_vm0, %v1916_v42  ;;  %1536 = vmatprep.mubr.msk.f32.mxu1 %vm103_vm0, %v1837_v53 }
 0x209   :  { %1546 = vmatprep.mubr.msk.f32.mxu0 %vm103_vm0, %v1143_v1 }
 0x20c   :  { %1547 = vmatmul.mubr.msk.f32.vlgmr.msra.gmra.mrb[12].mxu0 %vm103_vm0, %v1144_v48 }
 0x20d   :  { %1553 = vmatprep.mubr.msk.f32.mxu0 %vm103_vm0, %v1837_v53 }
 0x2d2   :  { %v1504_v2 = vpop.f32.mrb[8].mxu1 }
 0x2d3   :  { %694 = vst.msk [vmem:[#allocation9 + $0x48] sm:$0xff] %vm282_vm1, %v1504_v2  ;;  %v673_v39 = vpop.f32.mrb[9].mxu1 }
 0x2d4   :  { %693 = vst.msk [vmem:[#allocation9 + $0x40] sm:$0xff] %vm282_vm1, %v673_v39 }
 0x2d6   :  { %v1507_v14 = vpop.f32.mrb[10].mxu1 }
 0x2d7   :  { %v1521_v40 = vpop.f32.mrb[8].mxu0  ;;  %696 = vst.msk [vmem:[#allocation9 + $0x58] sm:$0xff] %vm282_vm1, %v1507_v14  ;;  %v683_v37 = vpop.f32.mrb[11].mxu1 }
 0x2d8   :  { %903 = vst.msk [vmem:[#allocation9 + $0x68] sm:$0xff] %vm282_vm1, %v1521_v40  ;;  %v882_v17 = vpop.f32.mrb[9].mxu0  ;;  %695 = vst.msk [vmem:[#allocation9 + $0x50] sm:$0xff] %vm282_vm1, %v683_v37 }
 0x2d9   :  { %902 = vst.msk [vmem:[#allocation9 + $0x60] sm:$0xff] %vm282_vm1, %v882_v17 }
 0x2da   :  { %v1531_v43 = vpop.f32.mrb[12].mxu1 }
 0x2db   :  { %v1524_v53 = vpop.f32.mrb[10].mxu0  ;;  %v1012_v44 = vpop.f32.mrb[13].mxu1 }
 0x2dc   :  { %905 = vst.msk [vmem:[#allocation9 + $0x78] sm:$0xff] %vm282_vm1, %v1524_v53  ;;  %v892_v45 = vpop.f32.mrb[11].mxu0  ;;  %v1595_v46 = vpack.c.bf16 %v1531_v43, %v1012_v44 }
 0x2dd   :  { %904 = vst.msk [vmem:[#allocation9 + $0x70] sm:$0xff] %vm282_vm1, %v892_v45 }
 0x2de   :  { %1596 = vmatprep.subr.bf16.mxu1 %v1595_v46 }
 0x2df   :  { %v1548_v47 = vpop.f32.mrb[12].mxu0  ;;  %1598 = vmatpush3.bf16.msra.mxu1 %v1595_v46 }
 0x2e0   :  { %v1217_v49 = vpop.f32.mrb[13].mxu0 }
 0x2e1   :  { %v1603_v20 = vpack.c.bf16 %v1548_v47, %v1217_v49 }
 0x2e2   :  { %1537 = vmatmul.mubr.msk.f32.vlgmr.msra.gmra.mrb[14].mxu1 %vm103_vm0, %v1894_v7 }
 0x2e3   :  { %1604 = vmatprep.subr.bf16.mxu0 %v1603_v20  ;;  %1539 = vmatprep.mubr.msk.f32.mxu1 %vm103_vm0, %v1908_v41 }
 0x2e4   :  { %1606 = vmatpush3.bf16.msra.mxu0 %v1603_v20 }
 0x2e6   :  { %1540 = vmatmul.mubr.msk.f32.gmra.mrb[16].mxu1 %vm103_vm0, %v1916_v42 }
 0x2e7   :  { %1554 = vmatmul.mubr.msk.f32.vlgmr.msra.gmra.mrb[14].mxu0 %vm103_vm0, %v1894_v7 }
 0x2e8   :  { %1556 = vmatprep.mubr.msk.f32.mxu0 %vm103_vm0, %v1908_v41 }
 0x2eb   :  { %1557 = vmatmul.mubr.msk.f32.gmra.mrb[16].mxu0 %vm103_vm0, %v1916_v42 }
 0x3b5   :  { %v1538_v50 = vpop.f32.mrb[14].mxu1 }
 0x3b6   :  { %1108 = vst.msk [vmem:[#allocation9 + $0x88] sm:$0xff] %vm282_vm1, %v1538_v50  ;;  %v1087_v51 = vpop.f32.mrb[15].mxu1 }
 0x3b7   :  { %1107 = vst.msk [vmem:[#allocation9 + $0x80] sm:$0xff] %vm282_vm1, %v1087_v51 }
 0x3b9   :  { %v1541_v52 = vpop.f32.mrb[16].mxu1 }
 0x3ba   :  { %v1555_v56 = vpop.f32.mrb[14].mxu0  ;;  %1110 = vst.msk [vmem:[#allocation9 + $0x98] sm:$0xff] %vm282_vm1, %v1541_v52  ;;  %v1097_v21 = vpop.f32.mrb[17].mxu1 }
 0x3bb   :  { %1313 = vst.msk [vmem:[#allocation9 + $0xa8] sm:$0xff] %vm282_vm1, %v1555_v56  ;;  %v1292_v7 = vpop.f32.mrb[15].mxu0  ;;  %1109 = vst.msk [vmem:[#allocation9 + $0x90] sm:$0xff] %vm282_vm1, %v1097_v21 }
 0x3bc   :  { %1312 = vst.msk [vmem:[#allocation9 + $0xa0] sm:$0xff] %vm282_vm1, %v1292_v7 }
 0x3be   :  { %v1558_v41 = vpop.f32.mrb[16].mxu0 }
 0x3bf   :  { %1315 = vst.msk [vmem:[#allocation9 + $0xb8] sm:$0xff] %vm282_vm1, %v1558_v41  ;;  %v1302_v42 = vpop.f32.mrb[17].mxu0 }
 0x3c0   :  { %1314 = vst.msk [vmem:[#allocation9 + $0xb0] sm:$0xff] %vm282_vm1, %v1302_v42 }
 0x3c1   :  { %1670 = shalt.err (!%p1667_p8)
}
 0x3c2   :  { %s1671_s18 = scalar_lea.hbm %s2060_s5, 3072 }
 0x3c3   :  { %p1672_p9 = scmp.ne.s32.totalorder %s2060_s5, %s1671_s18  ;;  %p1675_p10 = scmp.lt.u32.totalorder %s1671_s18, %s2060_s5 }
 0x3c5   :  { %p1677_p11 = pnand %p1675_p10, %p1672_p9 }
 0x3c7   :  { %1680 = shalt.err (!%p1677_p11)
}
 0x3c8   :  { %1327 = dma.vmem_to_hbm [thread:$0]  %s1322_s15, 3072, %s2060_s5, [#allocation4], %s1690_s1, %s1690_s1, %s1691_s6  }
 0x3c9   :  { %1687 = dma.done.wait [#allocation4], 3072  }
 0x3ca   :  { %1688 = vsyncadd [#allocation4], 4294964224 }
 0x3cb   :  { %1331 = vsyncpa [#allocation3], 1 }
 0x3cc   :  { %1332 = vsyncpa [#allocation4], 1 }
 0x3cd   :  { %1333 = vsyncpa [#allocation5], 1 }
 0x3ce   :  { %1334 = vsyncpa [#allocation8], 1 }

</bundles_post_ra>
